<compile_context>
chip_gen: v6e
topology: v6e:2x2x1
jax: 0.10.0
libtpu: 0.0.40
codegen_flags: <defaults>
</compile_context>

<pallas_src>
import functools

import jax
import jax.numpy as jnp
from jax.experimental import pallas as pl
from jax.experimental.pallas import tpu as pltpu


def _round_up(v, m):
    return ((v + m - 1) // m) * m


def _choose_l_tile(L, pool, target=1024):
    """Largest L-tile <= target that divides L, is a multiple of pool and keeps 8-row alignment.

    target=1024 amortizes the ~0.35us/step grid overhead (v6e guidance); with halo tiling the
    per-tile VMEM footprint is only a few MiB, so 1024 also fits v7x's 64 MiB VMEM easily."""
    for cand in range(min(L, target), 0, -1):
        if L % cand != 0 or cand % pool != 0:
            continue
        if cand == L or (cand % 8 == 0 and (cand // pool) % 8 == 0):
            return cand
    return L


def _estimate_vmem_bytes(TL, TLh, kcin, ksize, Cp, pool):
    """Rough per-step VMEM bound: double-buffered blocks + live f32/bf16 temporaries."""
    x_buf = _round_up(TLh, 8) * _round_up(kcin, 128) * 2        # x halo tile, bf16 (lane-padded)
    w1_buf = _round_up(kcin, 8) * Cp * 2                        # conv1 weight slab, bf16
    w2_buf = ksize * Cp * Cp * 2                                # conv2 per-tap weights, bf16
    vec_buf = 3 * 8 * Cp * 4                                    # b1 / scale / shift, f32
    enc_buf = TL * Cp * 2                                       # enc out block, bf16
    pool_buf = _round_up(TL // pool, 8) * Cp * 2                # pooled out block, bf16
    blocks = 2 * (x_buf + w1_buf + w2_buf + vec_buf + enc_buf + pool_buf)   # double-buffered
    temps = _round_up(TLh, 8) * Cp * (4 + 2) + TL * Cp * (4 + 4)            # h(f32+bf16), y, enc
    return blocks + temps


def contraction_kernel(x_ref, w1_ref, b1_ref, w2_ref, scale_ref, shift_ref,
                       pooled_ref, enc_ref, *, ksize, pad, pool, tile_l, seq_len):
    TL = tile_l
    TLh = TL + 2 * pad                    # conv1 rows produced for this tile (conv2 halo)
    Cp = w1_ref.shape[-1]                 # lane-dense (padded) channel count
    ts = pl.program_id(1) * TL            # first output row of this L tile (global position)

    # ---- conv1 (Cin -> Cp): ONE MXU matmul over the wrapper-built im2col halo window ----
    h = jnp.dot(x_ref[...], w1_ref[...], preferred_element_type=jnp.float32) + b1_ref[...]

    # Fused ReLU (MultiConv1D internal activation; dropout eval -> identity) + halo mask:
    # halo rows whose global position falls outside [0, L) are conv2's zero 'same' padding.
    if pad > 0:
        g = jax.lax.broadcasted_iota(jnp.int32, (TLh, Cp), 0) + (ts - pad)
        h = jnp.where((g >= 0) & (g < seq_len) & (h > 0.0), h, 0.0)
    else:
        h = jnp.maximum(h, 0.0)
    h = h.astype(jnp.bfloat16)            # bf16 before the conv2 MXU operands / shifted slices

    # ---- conv2 (Cp -> Cp): K accumulated MXU matmuls, contraction = Cp = 128 ----
    y = jnp.dot(h[0:TL, :], w2_ref[0], preferred_element_type=jnp.float32)
    for k in range(1, ksize):
        y = y + jnp.dot(h[k:k + TL, :], w2_ref[k], preferred_element_type=jnp.float32)

    # ---- folded BatchNorm1d (eval; conv2 bias folded into shift) + outer ReLU: f32 epilogue ----
    enc = jnp.maximum(y * scale_ref[...] + shift_ref[...], 0.0)
    enc_ref[...] = enc.astype(enc_ref.dtype)                     # lane-dense bf16 store

    # ---- MaxPool1d(pool): non-overlapping windows along the sublane axis ----
    # (reshape+max worked cleanly in the previous build; strided-max alternative noted in review)
    pooled_ref[...] = jnp.max(enc.reshape(TL // pool, pool, Cp), axis=1).astype(pooled_ref.dtype)


def contraction_layer(x_ncl, params, *, ksize, pool, l_tile=None):
    """x_ncl: (N, Cin, L) float32.  Returns (pooled (N,Cout,L//pool), enc (N,Cout,L)) in f32."""
    N, Cin, L = x_ncl.shape
    Cout = params["w1"].shape[-1]
    assert ksize % 2 == 1, "odd kernel_size assumed ('same' padding)"
    pad = (ksize - 1) // 2
    assert L % pool == 0

    Cp = _round_up(Cout, 128)                 # lane-dense channel padding
    TL = l_tile if l_tile is not None else _choose_l_tile(L, pool)
    assert L % TL == 0 and TL % pool == 0
    nLT = L // TL
    TLh = TL + 2 * pad
    KCin = ksize * Cin

    # NLC layout; zero-pad length by 2*pad (receptive field of both convs) and build conv1's
    # im2col columns once in the wrapper (x is tiny relative to enc).
    x_nlc = jnp.transpose(x_ncl, (0, 2, 1)).astype(jnp.float32)
    xp = jnp.pad(x_nlc, ((0, 0), (2 * pad, 2 * pad), (0, 0)))
    x_im = jnp.concatenate([xp[:, k:k + L + 2 * pad, :] for k in range(ksize)], axis=-1)
    x_im = x_im.astype(jnp.bfloat16)                             # (N, L+2*pad, K*Cin)

    # Per-tile halo windows (TL + 2*pad rows each) so the kernel keeps only O(TL) of x in VMEM
    # (review item 1).  The 2*pad duplicated rows per tile in HBM are negligible.
    x_tiles = jnp.stack([x_im[:, t * TL:t * TL + TLh, :] for t in range(nLT)], axis=1)
    # -> (N, nLT, TLh, K*Cin)

    # im2col weight slabs (bf16), channel-padded to Cp so all outputs are lane-dense.
    w1m = jnp.pad(params["w1"], ((0, 0), (0, 0), (0, Cp - Cout)))
    w1m = w1m.reshape(KCin, Cp).astype(jnp.bfloat16)             # (K*Cin, Cp)
    w2m = jnp.pad(params["w2"], ((0, 0), (0, Cp - Cout), (0, Cp - Cout))).astype(jnp.bfloat16)
    # -> (K, Cp, Cp): per-tap weights for the K-accumulate conv2

    def padc(v):
        return jnp.pad(v.astype(jnp.float32), ((0, 0), (0, Cp - Cout)))
    b1p = padc(params["b1"])
    scp = padc(params["scale"])
    # conv2 bias folded into the BN shift: (y + b2)*scale + shift == y*scale + (b2*scale + shift)
    shp = padc(params["b2"] * params["scale"] + params["shift"])

    kern = functools.partial(contraction_kernel, ksize=ksize, pad=pad, pool=pool,
                             tile_l=TL, seq_len=L)

    vmem_bytes = min(2 * _estimate_vmem_bytes(TL, TLh, KCin, ksize, Cp, pool) + (8 << 20),
                     48 << 20)                                   # headroom, v7x-safe cap

    pooled, enc = pl.pallas_call(
        kern,
        out_shape=(
            jax.ShapeDtypeStruct((N, L // pool, Cp), jnp.bfloat16),
            jax.ShapeDtypeStruct((N, L, Cp), jnp.bfloat16),
        ),
        grid_spec=pltpu.PrefetchScalarGridSpec(
            num_scalar_prefetch=0,
            grid=(N, nLT),
            in_specs=[
                pl.BlockSpec((None, None, TLh, KCin), lambda n, t: (n, t, 0, 0)),  # x halo tile
                pl.BlockSpec((KCin, Cp), lambda n, t: (0, 0)),                     # w1 slab
                pl.BlockSpec((1, Cp), lambda n, t: (0, 0)),                        # b1
                pl.BlockSpec((ksize, Cp, Cp), lambda n, t: (0, 0, 0)),             # w2 per-tap
                pl.BlockSpec((1, Cp), lambda n, t: (0, 0)),                        # bn scale
                pl.BlockSpec((1, Cp), lambda n, t: (0, 0)),                        # bn shift (+b2)
            ],
            out_specs=[
                pl.BlockSpec((None, TL // pool, Cp), lambda n, t: (n, t, 0)),
                pl.BlockSpec((None, TL, Cp), lambda n, t: (n, t, 0)),
            ],
        ),
        compiler_params=pltpu.CompilerParams(
            dimension_semantics=("parallel", "parallel"),
            vmem_limit_bytes=vmem_bytes,
        ),
    )(x_tiles, w1m, b1p, w2m, scp, shp)

    # Drop padded channels, cast back to f32, back to PyTorch NCL layout.
    pooled = jnp.transpose(pooled[:, :, :Cout].astype(jnp.float32), (0, 2, 1))
    enc = jnp.transpose(enc[:, :, :Cout].astype(jnp.float32), (0, 2, 1))
    return pooled, enc


def reference(x_ncl, params, *, ksize, pool, dot_dtype=jnp.bfloat16):
    """Pure-JAX reference with identical eval-mode, bf16-operand / f32-accumulate semantics."""
    pad = (ksize - 1) // 2
    x = jnp.transpose(x_ncl, (0, 2, 1)).astype(dot_dtype)  # NLC

    def conv(h, w, b):
        N, L, _ = h.shape
        hp = jnp.pad(h, ((0, 0), (pad, pad), (0, 0)))
        out = sum(jnp.einsum("nlc,cd->nld", hp[:, k:k + L, :], w[k].astype(dot_dtype),
                             preferred_element_type=jnp.float32) for k in range(ksize))
        return out + b

    h = jax.nn.relu(conv(x, params["w1"], params["b1"]))
    y = conv(h.astype(dot_dtype), params["w2"], params["b2"])
    enc = jax.nn.relu(y * params["scale"] + params["shift"])
    N, L, C = enc.shape
    pooled = jnp.max(enc.reshape(N, L // pool, pool, C), axis=2)
    return jnp.transpose(pooled, (0, 2, 1)), jnp.transpose(enc, (0, 2, 1))


def init_params(key, cin, cout, ksize):
    k1, k2, k3, k4 = jax.random.split(key, 4)
    w1 = 0.2 * jax.random.normal(k1, (ksize, cin, cout), jnp.float32)
    b1 = 0.1 * jax.random.normal(k2, (1, cout), jnp.float32)
    w2 = 0.2 * jax.random.normal(k3, (ksize, cout, cout), jnp.float32)
    b2 = 0.1 * jax.random.normal(k4, (1, cout), jnp.float32)
    # BatchNorm1d params: gamma, beta (deterministic), running stats at init values
    gamma = 1.0 + 0.1 * jnp.arange(cout, dtype=jnp.float32)[None, :]
    beta = 0.05 * jnp.arange(cout, dtype=jnp.float32)[None, :]
    running_mean = jnp.zeros((1, cout), jnp.float32)
    running_var = jnp.ones((1, cout), jnp.float32)
    eps = 1e-5
    scale = gamma / jnp.sqrt(running_var + eps)
    shift = beta - running_mean * scale
    return {"w1": w1, "b1": b1, "w2": w2, "b2": b2, "scale": scale, "shift": shift}


if __name__ == "__main__":
    KSIZE, POOL = 3, 2
    key = jax.random.PRNGKey(0)
    kx, kp, kx2 = jax.random.split(key, 3)

    # --- primary small case (single L tile) ---
    N, Cin, Cout, L = 2, 4, 8, 16
    x = jax.random.normal(kx, (N, Cin, L), jnp.float32)          # PyTorch Conv1d layout NCL
    params = init_params(kp, Cin, Cout, KSIZE)

    pooled, enc = contraction_layer(x, params, ksize=KSIZE, pool=POOL)
    jax.block_until_ready((pooled, enc))

    pooled_ref, enc_ref = reference(x, params, ksize=KSIZE, pool=POOL)
    assert pooled.shape == (N, Cout, L // POOL) and enc.shape == (N, Cout, L)
    # tolerance accounts for the bf16 enc/pooled storage in the kernel (rel err <= ~2e-3)
    assert jnp.allclose(pooled, pooled_ref, rtol=1e-2, atol=1e-2)
    assert jnp.allclose(enc, enc_ref, rtol=1e-2, atol=1e-2)

    # --- multi-tile case: exercises the per-tile halo windows and cross-tile halo mask ---
    L2 = 64
    x2 = jax.random.normal(kx2, (N, Cin, L2), jnp.float32)
    pooled2, enc2 = contraction_layer(x2, params, ksize=KSIZE, pool=POOL, l_tile=16)
    jax.block_until_ready((pooled2, enc2))
    pooled2_ref, enc2_ref = reference(x2, params, ksize=KSIZE, pool=POOL)
    assert pooled2.shape == (N, Cout, L2 // POOL) and enc2.shape == (N, Cout, L2)
    assert jnp.allclose(pooled2, pooled2_ref, rtol=1e-2, atol=1e-2)
    assert jnp.allclose(enc2, enc2_ref, rtol=1e-2, atol=1e-2)

    print("KERNEL_OK")
</pallas_src>

<mosaic_0001>
module attributes {stable_mosaic.version = 11 : i64} {
  func.func @contraction_kernel(%arg0: i32, %arg1: i32, %arg2: memref<1x1x18x12xbf16, #tpu.memory_space<vmem>>, %arg3: memref<12x128xbf16, #tpu.memory_space<vmem>>, %arg4: memref<1x128xf32, #tpu.memory_space<vmem>>, %arg5: memref<3x128x128xbf16, #tpu.memory_space<vmem>>, %arg6: memref<1x128xf32, #tpu.memory_space<vmem>>, %arg7: memref<1x128xf32, #tpu.memory_space<vmem>>, %arg8: memref<1x8x128xbf16, #tpu.memory_space<vmem>>, %arg9: memref<1x16x128xbf16, #tpu.memory_space<vmem>>) attributes {dimension_semantics = [#tpu.dimension_semantics<parallel>, #tpu.dimension_semantics<parallel>], iteration_bounds = array<i64: 2, 1>, scalar_prefetch = 0 : i64, scratch_operands = 0 : i64, tpu.core_type = #tpu.core_type<tc>, window_params = [{transform_indices = @transform_0, window_bounds = array<i64: 1, 1, 18, 12>}, {pipeline_mode = #tpu.pipeline_mode<synchronous>, transform_indices = @transform_1, window_bounds = array<i64: 12, 128>}, {pipeline_mode = #tpu.pipeline_mode<synchronous>, transform_indices = @transform_2, window_bounds = array<i64: 1, 128>}, {pipeline_mode = #tpu.pipeline_mode<synchronous>, transform_indices = @transform_3, window_bounds = array<i64: 3, 128, 128>}, {pipeline_mode = #tpu.pipeline_mode<synchronous>, transform_indices = @transform_4, window_bounds = array<i64: 1, 128>}, {pipeline_mode = #tpu.pipeline_mode<synchronous>, transform_indices = @transform_5, window_bounds = array<i64: 1, 128>}, {transform_indices = @transform_6, window_bounds = array<i64: 1, 8, 128>}, {transform_indices = @transform_7, window_bounds = array<i64: 1, 16, 128>}]} {
    %c16_i32 = arith.constant 16 : i32
    %0 = arith.muli %arg1, %c16_i32 : i32
    %c0 = arith.constant 0 : index
    %c0_0 = arith.constant 0 : index
    %c0_1 = arith.constant 0 : index
    %c0_2 = arith.constant 0 : index
    %1 = vector.load %arg2[%c0, %c0_0, %c0_1, %c0_2] : memref<1x1x18x12xbf16, #tpu.memory_space<vmem>>, vector<1x1x18x12xbf16>
    %2 = vector.shape_cast %1 : vector<1x1x18x12xbf16> to vector<18x12xbf16>
    %c0_3 = arith.constant 0 : index
    %c0_4 = arith.constant 0 : index
    %3 = vector.load %arg3[%c0_3, %c0_4] : memref<12x128xbf16, #tpu.memory_space<vmem>>, vector<12x128xbf16>
    %cst = arith.constant dense<0.000000e+00> : vector<18x128xf32>
    %4 = tpu.matmul %2, %3, %cst {dimension_numbers = #tpu.dot_dimension_numbers<[1], [0], [0], [1], [0, 0, 1, 1], [], []>} : vector<18x12xbf16>, vector<12x128xbf16>, vector<18x128xf32> -> vector<18x128xf32>
    %c0_5 = arith.constant 0 : index
    %c0_6 = arith.constant 0 : index
    %5 = vector.load %arg4[%c0_5, %c0_6] : memref<1x128xf32, #tpu.memory_space<vmem>>, vector<1x128xf32>
    %6 = vector.broadcast %5 : vector<1x128xf32> to vector<18x128xf32>
    %7 = arith.addf %4, %6 : vector<18x128xf32>
    %8 = tpu.iota {dimensions = array<i32: 0>} : vector<18x128xi32>
    %c1_i32 = arith.constant 1 : i32
    %9 = arith.subi %0, %c1_i32 : i32
    %10 = vector.broadcast %9 : i32 to vector<18x128xi32>
    %11 = arith.addi %8, %10 : vector<18x128xi32>
    %c0_i32 = arith.constant 0 : i32
    %12 = vector.broadcast %c0_i32 : i32 to vector<18x128xi32>
    %13 = arith.cmpi sge, %11, %12 : vector<18x128xi32>
    %c16_i32_7 = arith.constant 16 : i32
    %14 = vector.broadcast %c16_i32_7 : i32 to vector<18x128xi32>
    %15 = arith.cmpi slt, %11, %14 : vector<18x128xi32>
    %16 = arith.andi %13, %15 : vector<18x128xi1>
    %cst_8 = arith.constant 0.000000e+00 : f32
    %17 = vector.broadcast %cst_8 : f32 to vector<18x128xf32>
    %18 = arith.cmpf ogt, %7, %17 : vector<18x128xf32>
    %19 = arith.andi %16, %18 : vector<18x128xi1>
    %cst_9 = arith.constant 0.000000e+00 : f32
    %20 = vector.broadcast %cst_9 : f32 to vector<18x128xf32>
    %21 = arith.select %19, %7, %20 : vector<18x128xi1>, vector<18x128xf32>
    %22 = arith.truncf %21 : vector<18x128xf32> to vector<18x128xbf16>
    %23 = vector.extract_strided_slice %22 {offsets = [0, 0], sizes = [16, 128], strides = [1, 1]} : vector<18x128xbf16> to vector<16x128xbf16>
    %c0_10 = arith.constant 0 : index
    %c0_11 = arith.constant 0 : index
    %c0_12 = arith.constant 0 : index
    %24 = vector.load %arg5[%c0_10, %c0_11, %c0_12] : memref<3x128x128xbf16, #tpu.memory_space<vmem>>, vector<1x128x128xbf16>
    %25 = vector.shape_cast %24 : vector<1x128x128xbf16> to vector<128x128xbf16>
    %cst_13 = arith.constant dense<0.000000e+00> : vector<16x128xf32>
    %26 = tpu.matmul %23, %25, %cst_13 {dimension_numbers = #tpu.dot_dimension_numbers<[1], [0], [0], [1], [0, 0, 1, 1], [], []>} : vector<16x128xbf16>, vector<128x128xbf16>, vector<16x128xf32> -> vector<16x128xf32>
    %27 = vector.extract_strided_slice %22 {offsets = [1, 0], sizes = [16, 128], strides = [1, 1]} : vector<18x128xbf16> to vector<16x128xbf16>
    %c1 = arith.constant 1 : index
    %c0_14 = arith.constant 0 : index
    %c0_15 = arith.constant 0 : index
    %28 = vector.load %arg5[%c1, %c0_14, %c0_15] : memref<3x128x128xbf16, #tpu.memory_space<vmem>>, vector<1x128x128xbf16>
    %29 = vector.shape_cast %28 : vector<1x128x128xbf16> to vector<128x128xbf16>
    %cst_16 = arith.constant dense<0.000000e+00> : vector<16x128xf32>
    %30 = tpu.matmul %27, %29, %cst_16 {dimension_numbers = #tpu.dot_dimension_numbers<[1], [0], [0], [1], [0, 0, 1, 1], [], []>} : vector<16x128xbf16>, vector<128x128xbf16>, vector<16x128xf32> -> vector<16x128xf32>
    %31 = arith.addf %26, %30 : vector<16x128xf32>
    %32 = vector.extract_strided_slice %22 {offsets = [2, 0], sizes = [16, 128], strides = [1, 1]} : vector<18x128xbf16> to vector<16x128xbf16>
    %c2 = arith.constant 2 : index
    %c0_17 = arith.constant 0 : index
    %c0_18 = arith.constant 0 : index
    %33 = vector.load %arg5[%c2, %c0_17, %c0_18] : memref<3x128x128xbf16, #tpu.memory_space<vmem>>, vector<1x128x128xbf16>
    %34 = vector.shape_cast %33 : vector<1x128x128xbf16> to vector<128x128xbf16>
    %cst_19 = arith.constant dense<0.000000e+00> : vector<16x128xf32>
    %35 = tpu.matmul %32, %34, %cst_19 {dimension_numbers = #tpu.dot_dimension_numbers<[1], [0], [0], [1], [0, 0, 1, 1], [], []>} : vector<16x128xbf16>, vector<128x128xbf16>, vector<16x128xf32> -> vector<16x128xf32>
    %36 = arith.addf %31, %35 : vector<16x128xf32>
    %c0_20 = arith.constant 0 : index
    %c0_21 = arith.constant 0 : index
    %37 = vector.load %arg6[%c0_20, %c0_21] : memref<1x128xf32, #tpu.memory_space<vmem>>, vector<1x128xf32>
    %38 = vector.broadcast %37 : vector<1x128xf32> to vector<16x128xf32>
    %39 = arith.mulf %36, %38 : vector<16x128xf32>
    %c0_22 = arith.constant 0 : index
    %c0_23 = arith.constant 0 : index
    %40 = vector.load %arg7[%c0_22, %c0_23] : memref<1x128xf32, #tpu.memory_space<vmem>>, vector<1x128xf32>
    %41 = vector.broadcast %40 : vector<1x128xf32> to vector<16x128xf32>
    %42 = arith.addf %39, %41 : vector<16x128xf32>
    %cst_24 = arith.constant 0.000000e+00 : f32
    %43 = vector.broadcast %cst_24 : f32 to vector<16x128xf32>
    %44 = arith.maximumf %42, %43 : vector<16x128xf32>
    %45 = arith.truncf %44 : vector<16x128xf32> to vector<16x128xbf16>
    %c0_25 = arith.constant 0 : index
    %c0_26 = arith.constant 0 : index
    %c0_27 = arith.constant 0 : index
    %46 = vector.load %arg9[%c0_25, %c0_26, %c0_27] : memref<1x16x128xbf16, #tpu.memory_space<vmem>>, vector<1x16x128xbf16>
    %47 = vector.shape_cast %46 : vector<1x16x128xbf16> to vector<16x128xbf16>
    %48 = vector.shape_cast %45 : vector<16x128xbf16> to vector<1x16x128xbf16>
    tpu.vector_store %arg9[%c0_25, %c0_26, %c0_27], %48 {strides = array<i32>} : memref<1x16x128xbf16, #tpu.memory_space<vmem>>, vector<1x16x128xbf16>,
    %49 = vector.shape_cast %44 : vector<16x128xf32> to vector<8x2x128xf32>
    %cst_28 = arith.constant dense<0xFF800000> : vector<8x128xf32>
    %50 = vector.multi_reduction <maximumf>, %49, %cst_28 [1] : vector<8x2x128xf32> to vector<8x128xf32>
    %51 = arith.truncf %50 : vector<8x128xf32> to vector<8x128xbf16>
    %c0_29 = arith.constant 0 : index
    %c0_30 = arith.constant 0 : index
    %c0_31 = arith.constant 0 : index
    %52 = vector.load %arg8[%c0_29, %c0_30, %c0_31] : memref<1x8x128xbf16, #tpu.memory_space<vmem>>, vector<1x8x128xbf16>
    %53 = vector.shape_cast %52 : vector<1x8x128xbf16> to vector<8x128xbf16>
    %54 = vector.shape_cast %51 : vector<8x128xbf16> to vector<1x8x128xbf16>
    tpu.vector_store %arg8[%c0_29, %c0_30, %c0_31], %54 {strides = array<i32>} : memref<1x8x128xbf16, #tpu.memory_space<vmem>>, vector<1x8x128xbf16>,
    return
  }
  func.func @transform_0(%arg0: i32, %arg1: i32) -> (i32, i32, i32, i32) {
    %c0_i32 = arith.constant 0 : i32
    %c0_i32_0 = arith.constant 0 : i32
    %c0_i32_1 = arith.constant 0 : i32
    return %arg0, %arg1, %c0_i32, %c0_i32_0 : i32, i32, i32, i32
  }
  func.func @transform_1(%arg0: i32, %arg1: i32) -> (i32, i32) {
    %c0_i32 = arith.constant 0 : i32
    %c0_i32_0 = arith.constant 0 : i32
    %c0_i32_1 = arith.constant 0 : i32
    return %c0_i32, %c0_i32_0 : i32, i32
  }
  func.func @transform_2(%arg0: i32, %arg1: i32) -> (i32, i32) {
    %c0_i32 = arith.constant 0 : i32
    %c0_i32_0 = arith.constant 0 : i32
    %c0_i32_1 = arith.constant 0 : i32
    return %c0_i32, %c0_i32_0 : i32, i32
  }
  func.func @transform_3(%arg0: i32, %arg1: i32) -> (i32, i32, i32) {
    %c0_i32 = arith.constant 0 : i32
    %c0_i32_0 = arith.constant 0 : i32
    %c0_i32_1 = arith.constant 0 : i32
    %c0_i32_2 = arith.constant 0 : i32
    return %c0_i32, %c0_i32_0, %c0_i32_1 : i32, i32, i32
  }
  func.func @transform_4(%arg0: i32, %arg1: i32) -> (i32, i32) {
    %c0_i32 = arith.constant 0 : i32
    %c0_i32_0 = arith.constant 0 : i32
    %c0_i32_1 = arith.constant 0 : i32
    return %c0_i32, %c0_i32_0 : i32, i32
  }
  func.func @transform_5(%arg0: i32, %arg1: i32) -> (i32, i32) {
    %c0_i32 = arith.constant 0 : i32
    %c0_i32_0 = arith.constant 0 : i32
    %c0_i32_1 = arith.constant 0 : i32
    return %c0_i32, %c0_i32_0 : i32, i32
  }
  func.func @transform_6(%arg0: i32, %arg1: i32) -> (i32, i32, i32) {
    %c0_i32 = arith.constant 0 : i32
    %c0_i32_0 = arith.constant 0 : i32
    return %arg0, %arg1, %c0_i32 : i32, i32, i32
  }
  func.func @transform_7(%arg0: i32, %arg1: i32) -> (i32, i32, i32) {
    %c0_i32 = arith.constant 0 : i32
    %c0_i32_0 = arith.constant 0 : i32
    return %arg0, %arg1, %c0_i32 : i32, i32, i32
  }
}

</mosaic_0001>

<bundles_post_ra>
// kernel: tpu_custom_call.1
= control target key start
LH: loop header
LB: loop body
LE: loop exit
PB: predicated region body
PF: predicated region fallthrough
CT: control target
= control target key end

     0   :  { %13 = vsyncpa [#allocation3], 0  ;;  %s1827_s0 = inlined_call_operand.vmem [shape: bf16[2,1,18,12], index: 0, kind: input, shape index: {}]   ;;  %s1828_s1 = inlined_call_operand.vmem [shape: bf16[12,128], index: 1, kind: input, shape index: {}]   ;;  %s1829_s2 = inlined_call_operand.vmem [shape: f32[1,128], index: 2, kind: input, shape index: {}]   ;;  %s1830_s3 = inlined_call_operand.hbm [shape: bf16[3,128,128], index: 3, kind: input, shape index: {}]   ;;  %s1831_s4 = inlined_call_operand.vmem [shape: f32[1,128], index: 4, kind: input, shape index: {}]   ;;  %s1832_s5 = inlined_call_operand.vmem [shape: f32[1,128], index: 5, kind: input, shape index: {}]   ;;  %s1833_s6 = inlined_call_operand.hbm [shape: bf16[2,8,128], index: 6, kind: output, shape index: {0}]   ;;  %s1834_s7 = inlined_call_operand.hbm [shape: bf16[2,16,128], index: 7, kind: output, shape index: {1}]  }
   0x1   :  { %14 = vsyncpa [#allocation4], 0 }
   0x2   :  { %16 = vsyncpa [#allocation4 + $0x1], 0 }
   0x3   :  { %17 = vsyncpa [#allocation7], 0 }
   0x4   :  { %19 = vsyncpa [#allocation7 + $0x1], 0  ;;  %s1608_s24 = smov 0   ;;  %s1610_s25 = smov 0  }
   0x5   :  { %s1612_s26 = smov 0   ;;  %s1614_s27 = smov 0  }
   0x6   :  { %s1616_s28 = smov 0   ;;  %s1618_s29 = smov 0  }
   0x7 LB: > { %s1139_s30 = sadd.s32 4294967295, %s1556_s29   ;;  %s1140_s8 = sadd.s32 4294967294, %s1556_s29   ;;  %s1556_s29 = sphi %s1618_s29, %s25_s29   ;;  %s1552_s28 = sphi %s1616_s28, %s1843_s28   ;;  %s1548_s27 = sphi %s1614_s27, %s1842_s27   ;;  %s1544_s26 = sphi %s1612_s26, %s1841_s26   ;;  %s1540_s25 = sphi %s1610_s25, %s1840_s25   ;;  %s1536_s24 = sphi %s1608_s24, %s1839_s24  }
   0x8   : > { %s37_s9 = sadd.s32 1, %s1552_s28  ;;  %s179_s10 = sadd.s32 1, %s1544_s26 }
   0x9   : > { %p39_p0 = scmp.ge.s32.totalorder %s37_s9, 2  ;;  %p189_p1 = scmp.ne.s32.totalorder %s1544_s26, %s1540_s25 }
   0xa   : > { %p190_p2 = scmp.eq.s32.totalorder %s1139_s30, 1  ;;  %p195_p3 = scmp.ne.s32.totalorder %s1540_s25, %s1536_s24 }
   0xb   : > { %s1845_s9 = smov (%p39_p0, %s37_s9), 0  ;;  %p196_p5 = scmp.eq.s32.totalorder %s1140_s8, 1 }
   0xc   : > { %p1648_p4 = por %p190_p2, %p189_p1  ;;  %s174_s12 = ssub.s32 %s1552_s28, %s1845_s9 }
   0xd   : > { %p1141_p6 = scmp.ge.s32.totalorder %s1556_s29, 1  ;;  %p177_p7 = scmp.eq.s32.totalorder %s174_s12, 0 }
   0xe   : > { %p1655_p8 = por %p196_p5, %p195_p3  ;;  %p231_p9 = scmp.lt.s32.totalorder %s1556_s29, 3 }
   0xf   : > { %s1661_s14 = scalar_select %p177_p7, %s1544_s26, %s179_s10  }
  0x10   : > { %p1663_p10 = pnand %p1141_p6, %p231_p9  ;;  %p1667_p11 = scmp.eq.s32.totalorder %s1139_s30, 0 }
  0x11   : > { %s1558_s17 = smov [#allocation2]  }
  0x12   : > { %p1323_p12 = pneg %p1663_p10  ;;  %s249_s18 = sshll.u32 %s1558_s17, 4  ;;  %s250_s18 = int_to_ptr.vmem [resolvable:$true] %s249_s18 }
  0x13   : > { %s1431_s19 = scalar_lea.vmem %s250_s18, 3072  ;;  %p1439_p5 = scmp.lt.s32.totalorder %s250_s18, %s250_s18 }
  0x14   : > { %p1324_p13 = pnand %p1667_p11, %p1323_p12  ;;  %p1432_p1 = scmp.ne.s32.totalorder %s250_s18, %s1431_s19 }
  0x15   : > { %p1440_p6 = scmp.lt.s32.totalorder %s1431_s19, %s1431_s19 }
  0x16   : > { %p1422_p0 = pneg %p1324_p13 }
  0x17   : > { %p1441_p7 = por %p1440_p6, %p1439_p5 }
  0x18   : > { %p1434_p2 = pnand %p1432_p1, %p1422_p0 }
  0x1a   : > { %p1435_p3 = pneg %p1434_p2 }
  0x1c   : > { %p1442_p9 = pnand %p1441_p7, %p1435_p3 }
  0x1e   : > { %1445 = shalt.err (!%p1442_p9)
}
  0x1f   : > { %s1559_s20 = smov 64   ;;  %s1560_s21 = smov 4  }
  0x20   : > { %1326 = dma.hbm_to_vmem [thread:$0]  (!%p1324_p13), %s1830_s3, 3072, %s250_s18, [#allocation3], %s1559_s20, %s1559_s20, %s1560_s21  }
  0x21   : > { %283 = sbr.rel (%p1663_p10) target bundleno = 550 (0x226), region = 44 }
  0x26   : > { %1523 = dma.done.wait (%p1667_p11), [#allocation3], 3072  }
  0x27   : > { %1525 = vsyncadd (%p1667_p11), [#allocation3], 4294964224  ;;  %p324_p12 = scmp.lt.s32.totalorder %s1548_s27, 1  ;;  %v1561_v0 = vmov 0.0   ;;  %vm368_vm0 = vcmask 1045504   ;;  %vm361_vm1 = vcmask 97280   ;;  %v420_v21 = vlaneseq }
  0x28   : > { %1253 = vmatprep.subr.bf16.mxu1 %v1561_v0  ;;  %v1393_v1 = vld [vmem:[%s1828_s1] sm:$0x3f]   ;;  %v1396_v5 = vld [vmem:[#allocation2 + $0x38] sm:$0xff]   ;;  %v1397_v7 = vld [vmem:[#allocation2 + $0x30] sm:$0xff]   ;;  %vm1562_vm2 = vmmov 0   ;;  %vm693_vm12 = vcmask 1046528  }
  0x29   : > { %s325_s30 = scalar_select %p324_p12, %s1548_s27, 1  ;;  %1313 = vmatprep.subr.msk.bf16.mxu0 %vm368_vm0, %v1393_v1  ;;  %v370_v2 = vsel %vm368_vm0, %v1393_v1, 0  ;;  %v1398_v6 = vld [vmem:[#allocation2 + $0x78] sm:$0xff]   ;;  %v1400_v8 = vld [vmem:[#allocation2 + $0x70] sm:$0xff]   ;;  %v1399_v9 = vld [vmem:[#allocation2 + $0x28] sm:$0xff]   ;;  %1269 = vmatprep.mubr.msk.bf16.mxu1 %vm1562_vm2, %v1561_v0  ;;  %v1713_v22 = vshrl.u32 %v420_v21, 7 }
  0x2a   : > { %1248 = vmatpush3.bf16.msra.mxu0 %v370_v2  ;;  %1254 = vmatpush3.bf16.msra.mxu1 %v1398_v6  ;;  %v1402_v10 = vld [vmem:[#allocation2 + $0x68] sm:$0xff]   ;;  %v1401_v11 = vld [vmem:[#allocation2 + $0x20] sm:$0xff]   ;;  %v1403_v12 = vld [vmem:[#allocation2 + $0x18] sm:$0xff]   ;;  %vm482_vm11 = vsmask.f32 7424  ;;  %vm863_vm13 = vcmask 1041408  }
  0x2b   : > { %s1314_s8 = smul.u32 12, %s325_s30  ;;  %1273 = vmatprep.subr.bf16.mxu0 %v1561_v0  ;;  %1255 = vmatprep.subr.bf16.mxu1 %v1561_v0  ;;  %v1404_v13 = vld [vmem:[#allocation2 + $0x60] sm:$0xff]   ;;  %v1405_v14 = vld [vmem:[#allocation2 + $0x10] sm:$0xff]   ;;  %v1406_v15 = vld [vmem:[#allocation2 + $0x58] sm:$0xff]   ;;  %v423_v23 = vadd.s32 16, %v1713_v22  ;;  %v426_v27 = vadd.s32 4294967295, %v1713_v22 }
  0x2c   : > { %v1407_v16 = vld [vmem:[#allocation2 + $0x8] sm:$0xff]   ;;  %v1408_v17 = vld [vmem:[#allocation2 + $0x50] sm:$0xff]   ;;  %v1409_v18 = vld [vmem:[#allocation2] sm:$0xff]   ;;  %s1736_s30 = sand.u32 1, %s1540_s25   ;;  %s1211_s10 = sshll.u32 %s1548_s27, 7 }
  0x2d   : > { %s332_s15 = scalar_lea.vmem %s1827_s0, %s1314_s8  ;;  %v1410_v19 = vld [vmem:[#allocation2 + $0x48] sm:$0xff]   ;;  %v1411_v20 = vld [vmem:[#allocation2 + $0x40] sm:$0xff]   ;;  %v428_v24 = vadd.s32 4294967295, %v423_v23  ;;  %vm429_vm6 = vcmp.ge.s32.totalorder %v426_v27, 0  ;;  %v1412_v46 = vld [vmem:[#allocation2 + $0xb8] sm:$0xff]   ;;  %s1147_s8 = sshll.u32 %s1736_s30, 3 }
  0x2e   : > { %v1394_v3 = vld [vmem:[%s332_s15] sm:$0xff]   ;;  %v1395_v4 = vld [vmem:[%s332_s15 + $0x8] ss:$0 sps:$4 sm:$0x11]   ;;  %1256 = vmatpush3.bf16.msra.mxu1 %v1400_v8  ;;  %v1413_v48 = vld [vmem:[#allocation2 + $0xb0] sm:$0xff]   ;;  %s323_s12 = scalar_lea.vmem [#allocation6], %s1147_s8  ;;  %s1749_s16 = scalar_lea.hbm %s1834_s7, %s1211_s10 }
  0x2f   : > { %1249 = vmatprep.mubr.msk.bf16.mxu0 %vm361_vm1, %v1394_v3  ;;  %1257 = vmatprep.subr.bf16.mxu1 %v1561_v0  ;;  %v1149_v25 = vld [vmem:[%s1829_s2] ss:$0 sm:$0xff]  ;;  %vm434_vm3 = vcmp.lt.s32.totalorder %v428_v24, 16  ;;  %v1414_v49 = vld [vmem:[#allocation2 + $0xa8] sm:$0xff]   ;;  %v1416_v51 = vld [vmem:[#allocation2 + $0x98] sm:$0xff]   ;;  %s1012_s15 = sshll.u32 %s323_s12, 4  ;;  %s1751_s15 = int_to_ptr.vmem [resolvable:$true] %s1012_s15 }
  0x30   : > { %1250 = vmatmul.mubr.msk.bf16.vlgmr.msra.gmra.mxu0 %vm361_vm1, %v1395_v4  ;;  %v1415_v50 = vld [vmem:[#allocation2 + $0xa0] sm:$0xff]   ;;  %v1417_v52 = vld [vmem:[#allocation2 + $0x90] sm:$0xff]   ;;  %v1418_v53 = vld [vmem:[#allocation2 + $0x88] sm:$0xff]   ;;  %v1563_v3 = vmov 1983009808   ;;  %s983_s19 = scalar_lea.sflag [#allocation7], %s1736_s30 }
  0x31   : > { %1274 = vmatpush3.bf16.msra.mxu0 %v1396_v5  ;;  %1289 = vmatprep.mubr.msk.bf16.mxu0 %vm1562_vm2, %v1561_v0  ;;  %v1419_v54 = vld [vmem:[#allocation2 + $0x80] sm:$0xff]   ;;  %v823_v4 = vunpack.c.l.s4 %v1563_v3  ;;  %s1446_s20 = scalar_lea.vmem %s1751_s15, 128  ;;  %s1564_s21 = smov [#allocation6]  }
  0x32   : > { %1275 = vmatprep.subr.bf16.mxu0 %v1561_v0  ;;  %1258 = vmatpush3.bf16.msra.mxu1 %v1402_v10  ;;  %p1447_p10 = scmp.ne.s32.totalorder %s1751_s15, %s1446_s20  ;;  %s1450_s22 = sshll.u32 %s1564_s21, 4  ;;  %s1451_s22 = int_to_ptr.vmem [resolvable:$false] %s1450_s22 }
  0x33   : > { %1259 = vmatprep.subr.bf16.mxu1 %v1561_v0  ;;  %s1452_s23 = scalar_lea.vmem %s1451_s22, 256  ;;  %p1453_p0 = scmp.lt.s32.totalorder %s1751_s15, %s1451_s22 }
  0x34   : > { %p1448_p11 = pnand %p1447_p10, %p1648_p4  ;;  %p1454_p1 = scmp.lt.s32.totalorder %s1452_s23, %s1446_s20 }
  0x35   : > { %1276 = vmatpush3.bf16.msra.mxu0 %v1397_v7  ;;  %v824_v7 = vunpack.c.0.s8 %v823_v4 }
  0x36   : > { %1277 = vmatprep.subr.bf16.mxu0 %v1561_v0  ;;  %1260 = vmatpush3.bf16.msra.mxu1 %v1404_v13  ;;  %p1449_p13 = pneg %p1448_p11  ;;  %p1455_p2 = por %p1454_p1, %p1453_p0 }
  0x37   : > { %1261 = vmatprep.subr.bf16.mxu1 %v1561_v0 }
  0x38   : > { %p1456_p3 = pnand %p1455_p2, %p1449_p13 }
  0x39   : > { %1278 = vmatpush3.bf16.msra.mxu0 %v1399_v9  ;;  %v1183_v9 = vld [vmem:[%s1832_s5] ss:$0 sm:$0xff] }
  0x3a   : > { %1279 = vmatprep.subr.bf16.mxu0 %v1561_v0  ;;  %1262 = vmatpush3.bf16.msra.mxu1 %v1406_v15 }
  0x3b   : > { %1263 = vmatprep.subr.bf16.mxu1 %v1561_v0 }
  0x3d   : > { %1280 = vmatpush3.bf16.msra.mxu0 %v1401_v11 }
  0x3e   : > { %1281 = vmatprep.subr.bf16.mxu0 %v1561_v0  ;;  %1264 = vmatpush3.bf16.msra.mxu1 %v1408_v17 }
  0x3f   : > { %1265 = vmatprep.subr.bf16.mxu1 %v1561_v0 }
  0x41   : > { %1282 = vmatpush3.bf16.msra.mxu0 %v1403_v12 }
  0x42   : > { %1283 = vmatprep.subr.bf16.mxu0 %v1561_v0  ;;  %1266 = vmatpush3.bf16.msra.mxu1 %v1410_v19 }
  0x43   : > { %1267 = vmatprep.subr.bf16.mxu1 %v1561_v0 }
  0x45   : > { %1284 = vmatpush3.bf16.msra.mxu0 %v1405_v14  ;;  %v1739_v14 = vsub.s32 %v824_v7, %v1713_v22 }
  0x46   : > { %1285 = vmatprep.subr.bf16.mxu0 %v1561_v0  ;;  %1268 = vmatpush3.bf16.msra.mxu1 %v1411_v20 }
  0x47   : > { %1293 = vmatprep.subr.bf16.mxu1 %v1561_v0 }
  0x49   : > { %1286 = vmatpush3.bf16.msra.mxu0 %v1407_v16 }
  0x4a   : > { %1287 = vmatprep.subr.bf16.mxu0 %v1561_v0 }
  0x4d   : > { %1288 = vmatpush3.bf16.msra.mxu0 %v1409_v18 }
  0xf0   : > { %v1251_v26 = vpop.f32.mrf.mxu0 }
  0xf1   : > { %v415_v28 = vadd.f32 %v1251_v26, %v1149_v25 }
  0xf2   : > { %v406_v29 = vpop.f32.mrf.mxu0 }
  0xf3   : > { %vm440_vm4 = vcmp.gt.f32.partialorder %v415_v28, 0.0  ;;  %v407_v30 = vadd.f32 %v1149_v25, %v406_v29 }
  0xf4   : > { %vm443_vm5 = vmand %vm434_vm3, %vm440_vm4  ;;  %v1252_v31 = vpop.f32.mrf.mxu0 }
  0xf5   : > { %vm438_vm7 = vcmp.gt.f32.partialorder %v407_v30, 0.0  ;;  %v446_v32 = vsel %vm443_vm5, %v415_v28, 0.0 }
  0xf6   : > { %v409_v33 = vpop.f32.mrf.mxu0  ;;  %vm441_vm8 = vmand %vm429_vm6, %vm438_vm7  ;;  %v448_v35 = vpack.c.bf16 %v446_v32, %v446_v32 }
  0xf7   : > { %v410_v34 = vadd.f32 %v1149_v25, %v409_v33  ;;  %v444_v37 = vsel %vm441_vm8, %v407_v30, 0.0 }
  0xf8   : > { %v491_v40 = vshll.u32 %v448_v35, 16  ;;  %v695_v56 = vrot.slane %v448_v35, 1 }
  0xf9   : > { %vm439_vm9 = vcmp.gt.f32.partialorder %v410_v34, 0.0  ;;  %v1172_v36 = vpack.c.bf16 %v410_v34, %v407_v30 }
  0xfa   : > { %v445_v38 = vsel %vm439_vm9, %v410_v34, 0.0  ;;  %vm1171_vm10 = vmpackc.low %vm439_vm9, %vm441_vm8  ;;  %v493_v44 = vrot.slane %v491_v40, 1 }
  0xfb   : > { %v447_v39 = vpack.c.bf16 %v445_v38, %v444_v37  ;;  %1290 = vmatmul.mubr.msk.bf16.vlgmr.msra.gmra.mxu0 %vm1171_vm10, %v1172_v36 }
  0xfd   : > { %v486_v41 = vshll.u32 %v447_v39, 16  ;;  %v484_v42 = vshrl.u32 %v447_v39, 16  ;;  %v694_v55 = vrot.slane %v447_v39, 1 }
  0xff   : > { %v488_v43 = vrot.slane %v486_v41, 1  ;;  %v696_v57 = vsel %vm693_vm12, %v694_v55, %v695_v56 }
 0x101   : > { %v489_v45 = vor.u32 %v488_v43, %v484_v42 }
 0x103   : > { %v494_v47 = vsel %vm482_vm11, %v489_v45, %v493_v44 }
 0x104   : > { %1270 = vmatmul.mubr.bf16.vlgmr.msra.gmra.mxu1 %v494_v47 }
 0x105   : > { %1294 = vmatpush3.bf16.msra.mxu1 %v1412_v46  ;;  %1309 = vmatprep.mubr.msk.bf16.mxu1 %vm1562_vm2, %v1561_v0 }
 0x106   : > { %1295 = vmatprep.subr.bf16.mxu1 %v1561_v0 }
 0x109   : > { %1296 = vmatpush3.bf16.msra.mxu1 %v1413_v48 }
 0x10a   : > { %1297 = vmatprep.subr.bf16.mxu1 %v1561_v0 }
 0x10d   : > { %1298 = vmatpush3.bf16.msra.mxu1 %v1414_v49 }
 0x10e   : > { %1299 = vmatprep.subr.bf16.mxu1 %v1561_v0 }
 0x111   : > { %1300 = vmatpush3.bf16.msra.mxu1 %v1415_v50 }
 0x112   : > { %1301 = vmatprep.subr.bf16.mxu1 %v1561_v0 }
 0x115   : > { %1302 = vmatpush3.bf16.msra.mxu1 %v1416_v51 }
 0x116   : > { %1303 = vmatprep.subr.bf16.mxu1 %v1561_v0 }
 0x119   : > { %1304 = vmatpush3.bf16.msra.mxu1 %v1417_v52 }
 0x11a   : > { %1305 = vmatprep.subr.bf16.mxu1 %v1561_v0 }
 0x11d   : > { %1306 = vmatpush3.bf16.msra.mxu1 %v1418_v53 }
 0x11e   : > { %1307 = vmatprep.subr.bf16.mxu1 %v1561_v0  ;;  %v1182_v0 = vld [vmem:[%s1831_s4] ss:$0 sm:$0xff] }
 0x121   : > { %1308 = vmatpush3.bf16.msra.mxu1 %v1419_v54 }
 0x124   : > { %1310 = vmatmul.mubr.bf16.vlgmr.msra.gmra.mxu1 %v696_v57 }
 0x1bb   : > { %v667_v58 = vpop.f32.mrf.mxu0 }
 0x1bd   : > { %v1291_v59 = vpop.f32.mrf.mxu0 }
 0x1bf   : > { %v670_v60 = vpop.f32.mrf.mxu0 }
 0x1c1   : > { %v1292_v61 = vpop.f32.mrf.mxu0 }
 0x1c4   : > { %v578_v62 = vpop.f32.mrf.mxu1 }
 0x1c5   : > { %v668_v5 = vadd.f32 %v667_v58, %v578_v62 }
 0x1c6   : > { %v1271_v63 = vpop.f32.mrf.mxu1 }
 0x1c8   : > { %v581_v1 = vpop.f32.mrf.mxu1 }
 0x1c9   : > { %v671_v11 = vadd.f32 %v670_v60, %v581_v1 }
 0x1ca   : > { %v1272_v2 = vpop.f32.mrf.mxu1 }
 0x1e4   : > { %v780_v6 = vpop.f32.mrf.mxu1 }
 0x1e5   : > { %v787_v8 = vadd.f32 %v780_v6, %v668_v5 }
 0x1e6   : > { %v1311_v10 = vpop.f32.mrf.mxu1 }
 0x1e7   : > { %v796_v12 = vmul.f32 %v1182_v0, %v787_v8 }
 0x1e8   : > { %v783_v13 = vpop.f32.mrf.mxu1 }
 0x1e9   : > { %v805_v15 = vadd.f32 %v1183_v9, %v796_v12  ;;  %v788_v16 = vadd.f32 %v783_v13, %v671_v11 }
 0x1ea   : > { %v1312_v17 = vpop.f32.mrf.mxu1 }
 0x1eb   : > { %v807_v18 = vmax.f32 %v805_v15, 0.0  ;;  %v797_v19 = vmul.f32 %v1182_v0, %v788_v16 }
 0x1ed   : > { %v821_v20 = vcombine.high %v807_v18, %v807_v18  ;;  %v828_v21 = vrot.slane %v807_v18, %v1739_v14  ;;  %v806_v23 = vadd.f32 %v1183_v9, %v797_v19 }
 0x1ef   : > { %v835_v24 = vrot.slane %v821_v20, %v1739_v14  ;;  %v836_v25 = vcombine.high %v828_v21, %v828_v21  ;;  %v864_v22 = vsel %vm863_vm13, %v828_v21, -inf  ;;  %v808_v26 = vmax.f32 %v806_v23, 0.0 }
 0x1f0   : > { %v865_v27 = vrot.slane %v864_v22, 4 }
 0x1f1   : > { %v837_v28 = vcombine.high %v835_v24, %v835_v24  ;;  %v871_v29 = vsel %vm863_vm13, %v836_v25, -inf  ;;  %v878_v30 = vsel %vm863_vm13, %v835_v24, -inf  ;;  %v1215_v31 = vpack.c.bf16 %v808_v26, %v807_v18 }
 0x1f2   : > { %v866_v32 = vmax.f32 %v864_v22, %v865_v27  ;;  %v872_v33 = vrot.slane %v871_v29, 4  ;;  %v879_v34 = vrot.slane %v878_v30, 4  ;;  %v838_v35 = vcombine.high %v808_v26, %v808_v26 }
 0x1f3   : > { %v885_v36 = vsel %vm863_vm13, %v837_v28, -inf  ;;  %v845_v37 = vrot.slane %v808_v26, %v1739_v14  ;;  %1216 = vst [vmem:[%s323_s12] sm:$0xff] %v1215_v31  }
 0x1f4   : > { %v867_v38 = vrot.slane %v866_v32, 2  ;;  %v873_v39 = vmax.f32 %v871_v29, %v872_v33  ;;  %v880_v40 = vmax.f32 %v878_v30, %v879_v34  ;;  %v886_v41 = vrot.slane %v885_v36, 4 }
 0x1f5   : > { %1459 = shalt.err (!%p1456_p3)
}
 0x1f6   : > { %s1460_s8 = scalar_lea.hbm %s1749_s16, 128  ;;  %s1464_s17 = scalar_lea.hbm %s1834_s7, 256 }
 0x1f7   : > { %p1461_p5 = scmp.ne.s32.totalorder %s1749_s16, %s1460_s8  ;;  %p1465_p9 = scmp.lt.s32.totalorder %s1749_s16, %s1834_s7 }
 0x1f8   : > { %p1466_p12 = scmp.lt.s32.totalorder %s1464_s17, %s1460_s8 }
 0x1f9   : > { %p1462_p6 = pnand %p1461_p5, %p1648_p4 }
 0x1fa   : > { %p1467_p10 = por %p1466_p12, %p1465_p9 }
 0x1fb   : > { %p1463_p7 = pneg %p1462_p6 }
 0x1fd   : > { %p1468_p11 = pnand %p1467_p10, %p1463_p7 }
 0x1ff   : > { %1471 = shalt.err (!%p1468_p11)
}
 0x200   : > { %s1565_s20 = smov 64   ;;  %s1566_s22 = smov 4   ;;  %v852_v42 = vrot.slane %v838_v35, %v1739_v14  ;;  %v853_v43 = vcombine.high %v845_v37, %v845_v37  ;;  %v892_v44 = vsel %vm863_vm13, %v845_v37, -inf  ;;  %v868_v45 = vmax.f32 %v866_v32, %v867_v38 }
 0x201   : > { %1320 = dma.vmem_to_hbm [thread:$0]  (%p1648_p4), %s1751_s15, 128, %s1749_s16, %s983_s19, %s1565_s20, %s1565_s20, %s1566_s22   ;;  %v874_v46 = vrot.slane %v873_v39, 2  ;;  %v881_v47 = vrot.slane %v880_v40, 2  ;;  %v887_v48 = vmax.f32 %v885_v36, %v886_v41  ;;  %vm960_vm14 = vcmask 1041409  }
 0x202   : > { %v854_v49 = vcombine.high %v852_v42, %v852_v42  ;;  %v893_v50 = vrot.slane %v892_v44, 4  ;;  %v899_v51 = vsel %vm863_vm13, %v853_v43, -inf  ;;  %v906_v52 = vsel %vm863_vm13, %v852_v42, -inf  ;;  %s1146_s15 = sshll.u32 %s1736_s30, 2  ;;  %s1196_s16 = sshll.u32 %s1548_s27, 6 }
 0x203   : > { %v869_v53 = vrot.slane %v868_v45, 1  ;;  %v875_v54 = vmax.f32 %v873_v39, %v874_v46  ;;  %v882_v55 = vmax.f32 %v880_v40, %v881_v47  ;;  %v888_v56 = vrot.slane %v887_v48, 2  ;;  %s316_s19 = scalar_lea.vmem [#allocation5], %s1146_s15  ;;  %s995_s12 = scalar_lea.hbm %s1833_s6, %s1196_s16 }
 0x204   : > { %v894_v57 = vmax.f32 %v892_v44, %v893_v50  ;;  %v900_v58 = vrot.slane %v899_v51, 4  ;;  %v907_v59 = vrot.slane %v906_v52, 4  ;;  %v913_v60 = vsel %vm863_vm13, %v854_v49, -inf  ;;  %s997_s23 = sshll.u32 %s316_s19, 4  ;;  %s978_s17 = scalar_lea.sflag [#allocation4], %s1736_s30  ;;  %s998_s23 = int_to_ptr.vmem [resolvable:$true] %s997_s23 }
 0x205   : > { %v870_v61 = vmax.f32 %v868_v45, %v869_v53  ;;  %v876_v62 = vrot.slane %v875_v54, 1  ;;  %v883_v63 = vrot.slane %v882_v55, 1  ;;  %v889_v1 = vmax.f32 %v887_v48, %v888_v56  ;;  %s1472_s18 = scalar_lea.vmem %s998_s23, 64  ;;  %s1567_s21 = smov [#allocation5]  }
 0x206   : > { %v895_v2 = vrot.slane %v894_v57, 2  ;;  %v901_v3 = vmax.f32 %v899_v51, %v900_v58  ;;  %v908_v4 = vmax.f32 %v906_v52, %v907_v59  ;;  %v914_v5 = vrot.slane %v913_v60, 4  ;;  %p1473_p13 = scmp.ne.s32.totalorder %s998_s23, %s1472_s18  ;;  %s1476_s20 = sshll.u32 %s1567_s21, 4  ;;  %s1477_s20 = int_to_ptr.vmem [resolvable:$false] %s1476_s20 }
 0x207   : > { %v877_v6 = vmax.f32 %v875_v54, %v876_v62  ;;  %v884_v0 = vmax.f32 %v882_v55, %v883_v63  ;;  %v890_v7 = vrot.slane %v889_v1, 1  ;;  %v1203_v8 = vpack.c.bf16 %v870_v61, %v870_v61  ;;  %s1478_s27 = scalar_lea.vmem %s1477_s20, 128  ;;  %p1479_p2 = scmp.lt.s32.totalorder %s998_s23, %s1477_s20 }
 0x208   : > { %v896_v9 = vmax.f32 %v894_v57, %v895_v2  ;;  %v902_v10 = vrot.slane %v901_v3, 2  ;;  %v909_v11 = vrot.slane %v908_v4, 2  ;;  %v915_v12 = vmax.f32 %v913_v60, %v914_v5  ;;  %p1474_p0 = pnand %p1473_p13, %p1648_p4  ;;  %p1480_p3 = scmp.lt.s32.totalorder %s1478_s27, %s1472_s18 }
 0x209   : > { %v891_v13 = vmax.f32 %v889_v1, %v890_v7  ;;  %v1204_v14 = vpack.c.bf16 %v877_v6, %v877_v6  ;;  %v1205_v15 = vpack.c.bf16 %v884_v0, %v884_v0  ;;  %vm962_vm15 = vcmask 1042434  }
 0x20a   : > { %v897_v16 = vrot.slane %v896_v9, 1  ;;  %v903_v17 = vmax.f32 %v901_v3, %v902_v10  ;;  %v910_v18 = vmax.f32 %v908_v4, %v909_v11  ;;  %v916_v19 = vrot.slane %v915_v12, 2  ;;  %p1475_p1 = pneg %p1474_p0  ;;  %p1481_p5 = por %p1480_p3, %p1479_p2 }
 0x20b   : > { %v1206_v20 = vpack.c.bf16 %v891_v13, %v891_v13  ;;  %v952_v21 = vunpack.c.l.b16 %v1203_v8  ;;  %v953_v23 = vunpack.c.l.b16 %v1204_v14  ;;  %v954_v24 = vunpack.c.l.b16 %v1205_v15 }
 0x20c   : > { %v898_v25 = vmax.f32 %v896_v9, %v897_v16  ;;  %v904_v22 = vrot.slane %v903_v17, 1  ;;  %v911_v26 = vrot.slane %v910_v18, 1  ;;  %v917_v27 = vmax.f32 %v915_v12, %v916_v19  ;;  %p1482_p6 = pnand %p1481_p5, %p1475_p1 }
 0x20d   : > { %v955_v28 = vunpack.c.l.b16 %v1206_v20  ;;  %v961_v29 = vsel %vm960_vm14, %v953_v23, %v952_v21  ;;  %vm964_vm0 = vcmask 1043459   ;;  %vm966_vm1 = vcmask 1044484  }
 0x20e   : > { %v905_v30 = vmax.f32 %v903_v17, %v904_v22  ;;  %v1207_v31 = vpack.c.bf16 %v898_v25, %v898_v25  ;;  %v912_v32 = vmax.f32 %v910_v18, %v911_v26  ;;  %v918_v33 = vrot.slane %v917_v27, 1 }
 0x20f   : > { %v963_v34 = vsel %vm962_vm15, %v954_v24, %v961_v29  ;;  %vm968_vm2 = vcmask 1045509   ;;  %vm970_vm3 = vcmask 1046534   ;;  %vm972_vm4 = vcmask 1047559  }
 0x210   : > { %v1208_v35 = vpack.c.bf16 %v905_v30, %v905_v30  ;;  %v956_v36 = vunpack.c.l.b16 %v1207_v31  ;;  %v919_v37 = vmax.f32 %v917_v27, %v918_v33  ;;  %v1209_v38 = vpack.c.bf16 %v912_v32, %v912_v32 }
 0x211   : > { %v965_v39 = vsel %vm964_vm0, %v955_v28, %v963_v34 }
 0x212   : > { %v1210_v40 = vpack.c.bf16 %v919_v37, %v919_v37  ;;  %v957_v41 = vunpack.c.l.b16 %v1208_v35  ;;  %v958_v42 = vunpack.c.l.b16 %v1209_v38  ;;  %v967_v43 = vsel %vm966_vm1, %v956_v36, %v965_v39 }
 0x214   : > { %v959_v44 = vunpack.c.l.b16 %v1210_v40  ;;  %v969_v45 = vsel %vm968_vm2, %v957_v41, %v967_v43 }
 0x215   : > { %v971_v46 = vsel %vm970_vm3, %v958_v42, %v969_v45 }
 0x216   : > { %v973_v47 = vsel %vm972_vm4, %v959_v44, %v971_v46 }
 0x217   : > { %v974_v48 = vpack.c.b16 %v973_v47, %v973_v47 }
 0x219   : > { %976 = vst [vmem:[%s316_s19] sm:$0xf] %v974_v48 }
 0x21a   : > { %1485 = shalt.err (!%p1482_p6)
}
 0x21b   : > { %s1486_s22 = scalar_lea.hbm %s995_s12, 64  ;;  %s1490_s16 = scalar_lea.hbm %s1833_s6, 128 }
 0x21c   : > { %p1487_p7 = scmp.ne.s32.totalorder %s995_s12, %s1486_s22  ;;  %p1491_p10 = scmp.lt.s32.totalorder %s995_s12, %s1833_s6 }
 0x21d   : > { %p1492_p11 = scmp.lt.s32.totalorder %s1490_s16, %s1486_s22 }
 0x21e   : > { %p1488_p9 = pnand %p1487_p7, %p1648_p4 }
 0x21f   : > { %p1493_p13 = por %p1492_p11, %p1491_p10 }
 0x220   : > { %p1489_p12 = pneg %p1488_p9 }
 0x222   : > { %p1494_p0 = pnand %p1493_p13, %p1489_p12 }
 0x224   : > { %1497 = shalt.err (!%p1494_p0)
}
 0x225   : > { %1319 = dma.vmem_to_hbm [thread:$0]  (%p1648_p4), %s998_s23, 64, %s995_s12, %s978_s17  }
 0x226 PF: > { %p1336_p1 = scmp.ge.s32.totalorder %s1556_s29, 2  ;;  %s1027_s10 = sand.u32 1, %s1536_s24  }
 0x227   : > { %s1028_s18 = scalar_lea.sflag [#allocation4], %s1027_s10 }
 0x228   : > { %p1328_p2 = pnand %p1336_p1, %p1655_p8 }
 0x22a   : > { %p1329_p3 = pneg %p1328_p2 }
 0x22c   : > { %1527 = dma.done.wait (%p1329_p3), %s1028_s18, 64  }
 0x22d   : > { %1529 = vsyncadd (%p1329_p3), %s1028_s18, 4294967232  ;;  %s1037_s21 = scalar_lea.sflag [#allocation7], %s1027_s10 }
 0x22e   : > { %1531 = dma.done.wait (%p1329_p3), %s1037_s21, 128  }
 0x22f   : > { %1533 = vsyncadd (%p1329_p3), %s1037_s21, 4294967168  ;;  %s25_s29 = sadd.s32 1, %s1556_s29   ;;  %s1839_s24 = smov %s1540_s25 }
 0x230   : > { %p22_p5 = scmp.ge.s32.totalorder %s25_s29, 4   ;;  %s1840_s25 = smov %s1544_s26 }
 0x231   : > { %s1841_s26 = smov %s1661_s14  ;;  %s1842_s27 = smov %s1552_s28 }
 0x232   : > { %s1843_s28 = smov %s1845_s9  ;;  %24 = sbr.rel (!%p22_p5) target bundleno = 7 (0x7), region = 103 }
 0x237   :  { %1042 = vsyncpa [#allocation3], 1 }
 0x238   :  { %1044 = vsyncpa [#allocation3 + $0x1], 1 }
 0x239   :  { %1045 = vsyncpa [#allocation4], 1 }
 0x23a   :  { %1047 = vsyncpa [#allocation4 + $0x1], 1 }
 0x23b   :  { %1048 = vsyncpa [#allocation7], 1 }
 0x23c   :  { %1050 = vsyncpa [#allocation7 + $0x1], 1 }

</bundles_post_ra>
